<compile_context>
chip_gen: v6e
topology: v6e:2x2x1
jax: 0.10.0
libtpu: 0.0.40
codegen_flags: <defaults>
</compile_context>

<pallas_src>
from functools import partial

import jax
import jax.numpy as jnp
from jax import lax
from jax.experimental import pallas as pl
from jax.experimental.pallas import tpu as pltpu


# ----------------------------------------------------------------------------
# Kernel
# ----------------------------------------------------------------------------

def _gaussian_kl_kernel(mu1_ref, lv1_ref, mu2_ref, lv2_ref, out_ref, *,
                        acc_rows, block_rows, tiles_per_part, total_rows,
                        need_mask):
    p = pl.program_id(0)           # partition axis ("parallel")
    j = pl.program_id(1)           # row-tile axis ("arbitrary", accumulated)

    @pl.when(j == 0)
    def _init():
        out_ref[...] = jnp.zeros_like(out_ref)

    # Load in native dtype, upcast after the VMEM load (keeps DMA at input width).
    lv1 = lv1_ref[...].astype(jnp.float32)
    lv2 = lv2_ref[...].astype(jnp.float32)
    diff = mu1_ref[...].astype(jnp.float32) - mu2_ref[...].astype(jnp.float32)

    # Divide-free, overflow-safer form of (exp(lv1) + diff^2) / exp(lv2).
    term = (lv2 - lv1) + jnp.exp(lv1 - lv2) + diff * diff * jnp.exp(-lv2) - 1.0

    if need_mask:
        # Ragged / over-covered tiles: zero rows past the logical extent.
        # (Edge-block contents beyond the array bound are NOT guaranteed zero.)
        row0 = (p * tiles_per_part + j) * block_rows
        row_ids = row0 + lax.broadcasted_iota(jnp.int32, term.shape, 0)
        term = jnp.where(row_ids < total_rows, term, 0.0)

    bm, cols = term.shape
    # Vreg-shaped partial accumulation: (bm, C) -> (bm/acc_rows, acc_rows, C)
    # summed over the leading dim — pure VPU adds, no per-step XLU reduce.
    partial_sum = term.reshape(bm // acc_rows, acc_rows, cols).sum(axis=0)
    out_ref[...] += partial_sum


# ----------------------------------------------------------------------------
# Wrapper
# ----------------------------------------------------------------------------

def _sublane_multiple(dtypes):
    mult = 8
    for dt in dtypes:
        packing = max(1, 4 // jnp.dtype(dt).itemsize)   # bf16 packs 2/sublane
        mult = max(mult, 8 * packing)
    return mult


def _auto_block_rows(cols, itemsize, sublane_mult):
    # ~1.5 MiB per input tile -> 4 inputs x 2 pipeline buffers ~= 12 MiB live:
    # fits every generation's default scoped-VMEM limit (incl. v5e's 16 MiB)
    # while amortizing the ~0.35 us per-grid-step overhead.
    target_bytes = (3 << 20) // 2
    bm = max(sublane_mult, target_bytes // max(1, cols * itemsize))
    return max(sublane_mult, (bm // sublane_mult) * sublane_mult)


def gaussian_kl_loss(mu1, logvar1, mu2, logvar2, *, block_rows=None):
    """Pallas equivalent of GaussianKLLoss.forward; returns a scalar (f32)."""
    assert mu1.shape == logvar1.shape == mu2.shape == logvar2.shape
    assert mu1.ndim == 2
    n, d = mu1.shape
    inputs = (mu1, logvar1, mu2, logvar2)

    # Lane-densify: the loss is a plain sum over all elements (x 0.5/n), so a
    # row-major flatten to 128-wide rows preserves semantics and keeps every
    # vreg lane useful when d < 128 or d % 128 != 0.
    total = n * d
    if total % 128 == 0:
        rows, cols = total // 128, 128
    else:
        rows, cols = n, d                       # fallback: full-D rows
    inputs = tuple(a.reshape(rows, cols) for a in inputs)

    sub_mult = _sublane_multiple(a.dtype for a in inputs)
    max_itemsize = max(jnp.dtype(a.dtype).itemsize for a in inputs)

    if block_rows is None:
        bm = _auto_block_rows(cols, max_itemsize, sub_mult)
    else:
        bm = max(sub_mult, (int(block_rows) // sub_mult) * sub_mult)
    if bm >= rows:
        bm = rows                               # single full-extent tile
    n_tiles = pl.cdiv(rows, bm)

    # Leading "parallel" partition axis: shards rows across both v7x
    # TensorCores; harmless (serial) on single-core v5e/v6e.
    num_parts = 2 if n_tiles >= 2 else 1
    tiles_per_part = pl.cdiv(n_tiles, num_parts)

    acc_rows = 8 if bm % 8 == 0 else bm
    need_mask = (num_parts * tiles_per_part * bm) != rows

    def in_map(p, j):
        # Clamp so over-covered logical tiles re-read the last in-bounds block;
        # their contribution is zeroed by the in-kernel row mask.
        return (jnp.minimum(p * tiles_per_part + j, n_tiles - 1), 0)

    in_spec = pl.BlockSpec((bm, cols), in_map)
    out_spec = pl.BlockSpec((acc_rows, cols), lambda p, j: (p, 0))

    partials = pl.pallas_call(
        partial(_gaussian_kl_kernel,
                acc_rows=acc_rows, block_rows=bm,
                tiles_per_part=tiles_per_part, total_rows=rows,
                need_mask=need_mask),
        out_shape=jax.ShapeDtypeStruct((num_parts * acc_rows, cols),
                                       jnp.float32),
        grid=(num_parts, tiles_per_part),
        in_specs=[in_spec, in_spec, in_spec, in_spec],
        out_specs=out_spec,
        compiler_params=pltpu.CompilerParams(
            dimension_semantics=("parallel", "arbitrary")),
    )(*inputs)

    # Trivial final reduction over the tiny (num_parts*acc_rows, cols) slab.
    return (0.5 / n) * jnp.sum(partials)


# Pure-JAX reference (mirrors the torch code exactly) for correctness checks.
def gaussian_kl_loss_ref(mu1, logvar1, mu2, logvar2):
    numerator = jnp.exp(logvar1) + (mu1 - mu2) ** 2
    fraction = numerator / jnp.exp(logvar2)
    kl = 0.5 * jnp.sum(logvar2 - logvar1 + fraction - 1.0, axis=1)
    return jnp.mean(kl, axis=0)


# ----------------------------------------------------------------------------
# Main
# ----------------------------------------------------------------------------

if __name__ == "__main__":
    def make_inputs(key, n, d, dtype=jnp.float32):
        k1, k2, k3, k4 = jax.random.split(key, 4)
        mu1 = jax.random.normal(k1, (n, d), jnp.float32)
        lv1 = 0.2 * jax.random.normal(k2, (n, d), jnp.float32)
        mu2 = jax.random.normal(k3, (n, d), jnp.float32)
        lv2 = 0.2 * jax.random.normal(k4, (n, d), jnp.float32)
        return tuple(a.astype(dtype) for a in (mu1, lv1, mu2, lv2))

    # 1) Demo shape (batch=12, hidden=32): lane-dense flatten to (3, 128),
    #    single tile, single partition.
    args = make_inputs(jax.random.PRNGKey(0), 12, 32)
    ref = gaussian_kl_loss_ref(*args)
    out = gaussian_kl_loss(*args)
    jax.block_until_ready(out)
    assert jnp.isfinite(out)
    assert jnp.allclose(out, ref, rtol=1e-5, atol=1e-5), (out, ref)

    # 2) Fallback (non-flattenable) layout + ragged last tile + 2-way
    #    partition + in-kernel row masking (no jnp.pad anywhere).
    args2 = make_inputs(jax.random.PRNGKey(1), 50, 96)
    ref2 = gaussian_kl_loss_ref(*args2)
    out2 = gaussian_kl_loss(*args2, block_rows=16)
    jax.block_until_ready(out2)
    assert jnp.isfinite(out2)
    assert jnp.allclose(out2, ref2, rtol=1e-5, atol=1e-5), (out2, ref2)

    # 3) bf16 inputs loaded natively (half the HBM traffic), upcast in-kernel;
    #    lane-dense multi-tile path with both grid axes > 1.
    args3 = make_inputs(jax.random.PRNGKey(2), 64, 128, dtype=jnp.bfloat16)
    ref3 = gaussian_kl_loss_ref(*(a.astype(jnp.float32) for a in args3))
    out3 = gaussian_kl_loss(*args3, block_rows=16)
    jax.block_until_ready(out3)
    assert jnp.isfinite(out3)
    assert jnp.allclose(out3, ref3, rtol=1e-4, atol=1e-4), (out3, ref3)

    print("KERNEL_OK")
</pallas_src>

<mosaic_0001>
module attributes {stable_mosaic.version = 11 : i64} {
  func.func @_gaussian_kl_kernel(%arg0: i32, %arg1: i32, %arg2: memref<3x128xf32, #tpu.memory_space<vmem>>, %arg3: memref<3x128xf32, #tpu.memory_space<vmem>>, %arg4: memref<3x128xf32, #tpu.memory_space<vmem>>, %arg5: memref<3x128xf32, #tpu.memory_space<vmem>>, %arg6: memref<3x128xf32, #tpu.memory_space<vmem>>) attributes {dimension_semantics = [#tpu.dimension_semantics<parallel>, #tpu.dimension_semantics<arbitrary>], iteration_bounds = array<i64: 1, 1>, scalar_prefetch = 0 : i64, scratch_operands = 0 : i64, tpu.core_type = #tpu.core_type<tc>, window_params = [{transform_indices = @transform_0, window_bounds = array<i64: 3, 128>}, {transform_indices = @transform_1, window_bounds = array<i64: 3, 128>}, {transform_indices = @transform_2, window_bounds = array<i64: 3, 128>}, {transform_indices = @transform_3, window_bounds = array<i64: 3, 128>}, {transform_indices = @transform_4, window_bounds = array<i64: 3, 128>}]} {
    %c0_i32 = arith.constant 0 : i32
    %0 = arith.cmpi eq, %arg1, %c0_i32 : i32
    %1 = arith.extui %0 : i1 to i32
    %c0_i32_0 = arith.constant 0 : i32
    %2 = arith.cmpi ne, %1, %c0_i32_0 : i32
    scf.if %2 {
      %cst_14 = arith.constant 0.000000e+00 : f32
      %25 = vector.broadcast %cst_14 : f32 to vector<3x128xf32>
      %c0_15 = arith.constant 0 : index
      %c0_16 = arith.constant 0 : index
      %26 = vector.load %arg6[%c0_15, %c0_16] : memref<3x128xf32, #tpu.memory_space<vmem>>, vector<3x128xf32>
      tpu.vector_store %arg6[%c0_15, %c0_16], %25 {strides = array<i32>} : memref<3x128xf32, #tpu.memory_space<vmem>>, vector<3x128xf32>,
    } else {
    }
    %c0 = arith.constant 0 : index
    %c0_1 = arith.constant 0 : index
    %3 = vector.load %arg3[%c0, %c0_1] : memref<3x128xf32, #tpu.memory_space<vmem>>, vector<3x128xf32>
    %c0_2 = arith.constant 0 : index
    %c0_3 = arith.constant 0 : index
    %4 = vector.load %arg5[%c0_2, %c0_3] : memref<3x128xf32, #tpu.memory_space<vmem>>, vector<3x128xf32>
    %c0_4 = arith.constant 0 : index
    %c0_5 = arith.constant 0 : index
    %5 = vector.load %arg2[%c0_4, %c0_5] : memref<3x128xf32, #tpu.memory_space<vmem>>, vector<3x128xf32>
    %c0_6 = arith.constant 0 : index
    %c0_7 = arith.constant 0 : index
    %6 = vector.load %arg4[%c0_6, %c0_7] : memref<3x128xf32, #tpu.memory_space<vmem>>, vector<3x128xf32>
    %7 = arith.subf %5, %6 : vector<3x128xf32>
    %8 = arith.subf %4, %3 : vector<3x128xf32>
    %9 = arith.subf %3, %4 : vector<3x128xf32>
    %10 = math.exp %9 : vector<3x128xf32>
    %11 = arith.addf %8, %10 : vector<3x128xf32>
    %12 = arith.mulf %7, %7 : vector<3x128xf32>
    %cst = arith.constant 0.000000e+00 : f32
    %13 = vector.broadcast %cst : f32 to vector<3x128xf32>
    %14 = arith.subf %13, %4 : vector<3x128xf32>
    %15 = math.exp %14 : vector<3x128xf32>
    %16 = arith.mulf %12, %15 : vector<3x128xf32>
    %17 = arith.addf %11, %16 : vector<3x128xf32>
    %cst_8 = arith.constant 1.000000e+00 : f32
    %18 = vector.broadcast %cst_8 : f32 to vector<3x128xf32>
    %19 = arith.subf %17, %18 : vector<3x128xf32>
    %20 = vector.shape_cast %19 : vector<3x128xf32> to vector<1x3x128xf32>
    %cst_9 = arith.constant dense<0.000000e+00> : vector<3x128xf32>
    %21 = vector.multi_reduction <add>, %20, %cst_9 [0] : vector<1x3x128xf32> to vector<3x128xf32>
    %c0_10 = arith.constant 0 : index
    %c0_11 = arith.constant 0 : index
    %22 = vector.load %arg6[%c0_10, %c0_11] : memref<3x128xf32, #tpu.memory_space<vmem>>, vector<3x128xf32>
    %23 = arith.addf %22, %21 : vector<3x128xf32>
    %c0_12 = arith.constant 0 : index
    %c0_13 = arith.constant 0 : index
    %24 = vector.load %arg6[%c0_12, %c0_13] : memref<3x128xf32, #tpu.memory_space<vmem>>, vector<3x128xf32>
    tpu.vector_store %arg6[%c0_12, %c0_13], %23 {strides = array<i32>} : memref<3x128xf32, #tpu.memory_space<vmem>>, vector<3x128xf32>,
    return
  }
  func.func @transform_0(%arg0: i32, %arg1: i32) -> (i32, i32) {
    %c1_i32 = arith.constant 1 : i32
    %0 = arith.muli %arg0, %c1_i32 : i32
    %1 = arith.addi %0, %arg1 : i32
    %c0_i32 = arith.constant 0 : i32
    %2 = arith.minsi %1, %c0_i32 : i32
    %c0_i32_0 = arith.constant 0 : i32
    %c0_i32_1 = arith.constant 0 : i32
    return %2, %c0_i32_0 : i32, i32
  }
  func.func @transform_1(%arg0: i32, %arg1: i32) -> (i32, i32) {
    %c1_i32 = arith.constant 1 : i32
    %0 = arith.muli %arg0, %c1_i32 : i32
    %1 = arith.addi %0, %arg1 : i32
    %c0_i32 = arith.constant 0 : i32
    %2 = arith.minsi %1, %c0_i32 : i32
    %c0_i32_0 = arith.constant 0 : i32
    %c0_i32_1 = arith.constant 0 : i32
    return %2, %c0_i32_0 : i32, i32
  }
  func.func @transform_2(%arg0: i32, %arg1: i32) -> (i32, i32) {
    %c1_i32 = arith.constant 1 : i32
    %0 = arith.muli %arg0, %c1_i32 : i32
    %1 = arith.addi %0, %arg1 : i32
    %c0_i32 = arith.constant 0 : i32
    %2 = arith.minsi %1, %c0_i32 : i32
    %c0_i32_0 = arith.constant 0 : i32
    %c0_i32_1 = arith.constant 0 : i32
    return %2, %c0_i32_0 : i32, i32
  }
  func.func @transform_3(%arg0: i32, %arg1: i32) -> (i32, i32) {
    %c1_i32 = arith.constant 1 : i32
    %0 = arith.muli %arg0, %c1_i32 : i32
    %1 = arith.addi %0, %arg1 : i32
    %c0_i32 = arith.constant 0 : i32
    %2 = arith.minsi %1, %c0_i32 : i32
    %c0_i32_0 = arith.constant 0 : i32
    %c0_i32_1 = arith.constant 0 : i32
    return %2, %c0_i32_0 : i32, i32
  }
  func.func @transform_4(%arg0: i32, %arg1: i32) -> (i32, i32) {
    %c0_i32 = arith.constant 0 : i32
    %c0_i32_0 = arith.constant 0 : i32
    return %arg0, %c0_i32 : i32, i32
  }
}

</mosaic_0001>

<bundles_post_ra>
// kernel: tpu_custom_call.1
= control target key start
LH: loop header
LB: loop body
LE: loop exit
PB: predicated region body
PF: predicated region fallthrough
CT: control target
= control target key end

     0   :  { %9 = vsyncpa [#allocation3], 0  ;;  %s299_s0 = inlined_call_operand.hbm [shape: f32[3,128], index: 0, kind: input, shape index: {}]   ;;  %s300_s1 = inlined_call_operand.hbm [shape: f32[3,128], index: 1, kind: input, shape index: {}]   ;;  %s301_s2 = inlined_call_operand.hbm [shape: f32[3,128], index: 2, kind: input, shape index: {}]   ;;  %s302_s3 = inlined_call_operand.vmem [shape: f32[3,128], index: 3, kind: input, shape index: {}]   ;;  %s303_s4 = inlined_call_operand.hbm [shape: f32[3,128], index: 4, kind: output, shape index: {}]  }
   0x1   :  { %10 = vsyncpa [#allocation6], 0 }
   0x2   :  { %11 = vsyncpa [#allocation4], 0  ;;  %s254_s15 = smov [#allocation5]   ;;  %s255_s17 = smov [#allocation2]  }
   0x3   :  { %s38_s16 = sshll.u32 %s254_s15, 4  ;;  %s23_s18 = sshll.u32 %s255_s17, 4  ;;  %s39_s16 = int_to_ptr.vmem [resolvable:$true] %s38_s16  ;;  %s24_s18 = int_to_ptr.vmem [resolvable:$true] %s23_s18 }
   0x4   :  { %s176_s19 = scalar_lea.vmem %s39_s16, 64  ;;  %p181_p1 = scmp.lt.s32.totalorder %s39_s16, %s39_s16 }
   0x5   :  { %p177_p0 = scmp.ne.s32.totalorder %s39_s16, %s176_s19  ;;  %p182_p2 = scmp.lt.s32.totalorder %s176_s19, %s176_s19 }
   0x7   :  { %p183_p3 = por %p182_p2, %p181_p1 }
   0x9   :  { %p184_p4 = pnand %p183_p3, %p177_p0 }
   0xb   :  { %187 = shalt.err (!%p184_p4)
}
   0xc   :  { %41 = dma.hbm_to_vmem [thread:$0]  %s300_s1, 64, %s39_s16, [#allocation6]  }
   0xd   :  { %s196_s22 = scalar_lea.vmem %s24_s18, 64  ;;  %p201_p6 = scmp.lt.s32.totalorder %s24_s18, %s24_s18 }
   0xe   :  { %p197_p5 = scmp.ne.s32.totalorder %s24_s18, %s196_s22  ;;  %p202_p7 = scmp.lt.s32.totalorder %s196_s22, %s196_s22 }
  0x10   :  { %p203_p8 = por %p202_p7, %p201_p6 }
  0x12   :  { %p204_p9 = pnand %p203_p8, %p197_p5 }
  0x14   :  { %207 = shalt.err (!%p204_p9)
}
  0x15   :  { %26 = dma.hbm_to_vmem [thread:$0]  %s299_s0, 64, %s24_s18, [#allocation3]  }
  0x16   :  { %s256_s25 = smov [#allocation7]  }
  0x17   :  { %s53_s26 = sshll.u32 %s256_s25, 4  ;;  %s54_s26 = int_to_ptr.vmem [resolvable:$true] %s53_s26 }
  0x18   :  { %s216_s27 = scalar_lea.vmem %s54_s26, 64  ;;  %p221_p11 = scmp.lt.s32.totalorder %s54_s26, %s54_s26 }
  0x19   :  { %p217_p10 = scmp.ne.s32.totalorder %s54_s26, %s216_s27  ;;  %p222_p12 = scmp.lt.s32.totalorder %s216_s27, %s216_s27 }
  0x1b   :  { %p223_p13 = por %p222_p12, %p221_p11 }
  0x1d   :  { %p224_p0 = pnand %p223_p13, %p217_p10 }
  0x1f   :  { %227 = shalt.err (!%p224_p0)
}
  0x20   :  { %56 = dma.hbm_to_vmem [thread:$0]  %s301_s2, 64, %s54_s26, [#allocation6]  }
  0x21   :  { %248 = dma.done.wait [#allocation3], 64  }
  0x22   :  { %249 = vsyncadd [#allocation3], 4294967232 }
  0x23   :  { %250 = dma.done.wait [#allocation6], 128  }
  0x24   :  { %251 = vsyncadd [#allocation6], 4294967168  ;;  %v257_v0 = vmov 0.0   ;;  %v109_v1 = vld [vmem:[#allocation5] sm:$0x7]  ;;  %s258_s2 = smov [#allocation8]  }
  0x25   :  { %108 = vst [vmem:[#allocation8] sm:$0x7] %v257_v0  ;;  %v110_v2 = vld [vmem:[%s302_s3] sm:$0x7]  ;;  %v112_v8 = vld [vmem:[#allocation7] sm:$0x7] }
  0x26   :  { %v115_v3 = vsub.f32 %v109_v1, %v110_v2  ;;  %v120_v4 = vsub.f32 0.0, %v110_v2  ;;  %v111_v7 = vld [vmem:[#allocation2] sm:$0x7]  ;;  %v114_v10 = vsub.f32 %v110_v2, %v109_v1  ;;  %s136_s30 = sshll.u32 %s258_s2, 4  ;;  %s137_s30 = int_to_ptr.vmem [resolvable:$true] %s136_s30 }
  0x27   :  { %v113_v9 = vsub.f32 %v111_v7, %v112_v8  ;;  %s228_s3 = scalar_lea.vmem %s137_s30, 64  ;;  %p233_p2 = scmp.lt.s32.totalorder %s137_s30, %s137_s30 }
  0x28   :  { %v116_v5 = vmul.f32 1.442695, %v115_v3  ;;  %v121_v6 = vmul.f32 1.442695, %v120_v4  ;;  %p229_p1 = scmp.ne.s32.totalorder %s137_s30, %s228_s3  ;;  %p234_p3 = scmp.lt.s32.totalorder %s228_s3, %s228_s3 }
  0x29   :  { %v119_v11 = vmul.f32 %v113_v9, %v113_v9 }
  0x2a   :  { %164 = vpow2.f32 %v116_v5  ;;  %p235_p4 = por %p234_p3, %p233_p2 }
  0x2b   :  { %166 = vpow2.f32 %v121_v6 }
  0x2c   :  { %v127_v17 = vld [vmem:[#allocation8] sm:$0x7]  ;;  %p236_p5 = pnand %p235_p4, %p229_p1 }
  0x37   :  { %v165_v12 = vpop.eup %164 }
  0x38   :  { %v167_v13 = vpop.eup %166  ;;  %v118_v14 = vadd.f32 %v165_v12, %v114_v10 }
  0x39   :  { %v123_v15 = vmul.f32 %v167_v13, %v119_v11 }
  0x3b   :  { %v124_v16 = vadd.f32 %v123_v15, %v118_v14 }
  0x3d   :  { %v158_v18 = vadd.f32 -1.0, %v124_v16 }
  0x3f   :  { %v128_v19 = vadd.f32 %v158_v18, %v127_v17 }
  0x41   :  { %129 = vst [vmem:[#allocation8] sm:$0x7] %v128_v19 }
  0x42   :  { %239 = shalt.err (!%p236_p5)
}
  0x43   :  { %139 = dma.vmem_to_hbm [thread:$0]  %s137_s30, 64, %s303_s4, [#allocation4]  }
  0x44   :  { %252 = dma.done.wait [#allocation4], 64  }
  0x45   :  { %253 = vsyncadd [#allocation4], 4294967232 }
  0x46   :  { %143 = vsyncpa [#allocation3], 1 }
  0x47   :  { %144 = vsyncpa [#allocation6], 1 }
  0x48   :  { %145 = vsyncpa [#allocation4], 1 }

</bundles_post_ra>
